<compile_context>
chip_gen: v7x
topology: tpu7x:2x2x1
jax: 0.10.0
libtpu: 0.0.40
codegen_flags: <defaults>
</compile_context>

<pallas_src>
import jax
import jax.numpy as jnp
from jax import lax
from jax.experimental import pallas as pl
from jax.experimental.pallas import tpu as pltpu


def conv3_silu_kernel(x_ref, t_ref, b_ref, o_ref):
    # x_ref : (1, H, K)  f32  im2col slab, K = 3*W*C (kh, w, c folded into K)
    # t_ref : (K, L)     bf16 block-Toeplitz weights, L = W*Cout
    # b_ref : (1, L)     f32  bias tiled along W
    # o_ref : (1, H, L)  f32  output rows (lane-dense, L = 128)
    x = x_ref[0].astype(jnp.bfloat16)                       # one cast, one slab
    y = jnp.dot(x, t_ref[...], preferred_element_type=jnp.float32)
    y = y + b_ref[...]                                      # f32 bias add
    y = y * jax.nn.sigmoid(y)                               # SiLU in f32 (EUP)
    o_ref[0] = y.astype(o_ref.dtype)


def precompute_conv3_params(weight_oihw, bias, W):
    """Static per-layer prep: block-Toeplitz weights + tiled bias.

    T[kh*W*C + wp*C + ci, w*Cout + co] = weight[co, ci, kh, wp - w + 1]
    with out-of-range kw (i.e. wp outside [w-1, w+1] ∩ [0, W-1]) dropped,
    which bakes the horizontal SAME padding into the weights.
    """
    Cout, C, _, _ = weight_oihw.shape
    w_hwio = jnp.transpose(weight_oihw, (2, 3, 1, 0)).astype(jnp.float32)  # (3,3,C,Cout)
    w_idx = jnp.arange(W)
    # sel[w, kw, wp] = 1 iff wp == w + kw - 1  (wp restricted to [0, W-1])
    sel = (w_idx[:, None, None] + jnp.arange(3)[None, :, None] - 1
           == w_idx[None, None, :]).astype(jnp.float32)                    # (W,3,W)
    T = jnp.einsum("wkp,hkio->hpiwo", sel, w_hwio)                         # (3,W,C,W,Cout)
    T = T.reshape(3 * W * C, W * Cout).astype(jnp.bfloat16)                # MXU operand
    b_rows = jnp.tile(bias.astype(jnp.float32), (W,)).reshape(1, W * Cout)
    return T, b_rows


def conv3block_forward(x_nchw, T, b_rows):
    """Forward matching nn.Conv2d(dim, dim_out, 3, 1, 1) + SiLU.

    x_nchw : (N, C, H, W) float32
    T      : (3*W*C, W*Cout) bfloat16   (from precompute_conv3_params)
    b_rows : (1, W*Cout) float32
    returns: (N, Cout, H, W) float32
    """
    N, C, H, W = x_nchw.shape
    K = T.shape[0]            # 3*W*C
    L = T.shape[1]            # W*Cout
    Cout = L // W

    # Boundary layout glue: NCHW -> NHWC, 2 vertical halo rows, kh-window stack.
    # TODO(synk): if the caller keeps activations NHWC end-to-end these
    # transposes (and the final one) disappear entirely.
    x_nhwc = jnp.transpose(x_nchw, (0, 2, 3, 1))                     # (N,H,W,C)
    x_vpad = jnp.pad(x_nhwc, ((0, 0), (1, 1), (0, 0), (0, 0)))       # (N,H+2,W,C)
    slab = jnp.stack([x_vpad[:, kh:kh + H] for kh in range(3)], axis=2)  # (N,H,3,W,C)
    x_rows = slab.reshape(N, H, K).astype(jnp.float32)               # (N,H,K)

    out_rows = pl.pallas_call(
        conv3_silu_kernel,
        out_shape=jax.ShapeDtypeStruct((N, H, L), jnp.float32),
        grid_spec=pltpu.PrefetchScalarGridSpec(
            num_scalar_prefetch=0,
            grid=(N,),                                   # 2 independent steps
            in_specs=[
                pl.BlockSpec((1, H, K), lambda n: (n, 0, 0)),
                pl.BlockSpec((K, L), lambda n: (0, 0)),  # weights resident
                pl.BlockSpec((1, L), lambda n: (0, 0)),  # bias resident
            ],
            out_specs=pl.BlockSpec((1, H, L), lambda n: (n, 0, 0)),
        ),
        compiler_params=pltpu.CompilerParams(
            dimension_semantics=("parallel",)),
    )(x_rows, T, b_rows)

    out_nhwc = out_rows.reshape(N, H, W, Cout)
    return jnp.transpose(out_nhwc, (0, 3, 1, 2))                     # (N,Cout,H,W)


def _reference(x_nchw, weight_oihw, bias):
    """Pure-JAX f32 reference (lax conv) for correctness checking."""
    x_nhwc = jnp.transpose(x_nchw, (0, 2, 3, 1))
    w_hwio = jnp.transpose(weight_oihw, (2, 3, 1, 0))
    y = lax.conv_general_dilated(
        x_nhwc, w_hwio, window_strides=(1, 1), padding="SAME",
        dimension_numbers=("NHWC", "HWIO", "NHWC"),
        precision=lax.Precision.HIGHEST)
    y = y + bias[None, None, None, :]
    y = y * jax.nn.sigmoid(y)
    return jnp.transpose(y, (0, 3, 1, 2))


if __name__ == "__main__":
    # Small shapes consistent with the module: dim=4 -> dim_out=8, 16x16 spatial.
    N, C, H, W = 2, 4, 16, 16
    Cout = 8

    key = jax.random.PRNGKey(0)
    kx, kw, kb = jax.random.split(key, 3)
    x = jax.random.normal(kx, (N, C, H, W), dtype=jnp.float32)
    # Deterministic synthetic parameters (Conv2d weight (Cout, C, 3, 3), bias (Cout,)).
    fan_in = C * 3 * 3
    bound = 1.0 / jnp.sqrt(fan_in)
    weight = jax.random.uniform(kw, (Cout, C, 3, 3), jnp.float32, -bound, bound)
    bias = jax.random.uniform(kb, (Cout,), jnp.float32, -bound, bound)

    # Parameter prep is hoisted out of the per-call forward (static per layer).
    T, b_rows = precompute_conv3_params(weight, bias, W)
    T, b_rows = jax.block_until_ready((T, b_rows))

    fwd = jax.jit(conv3block_forward)
    out = fwd(x, T, b_rows)
    out = jax.block_until_ready(out)

    ref = _reference(x, weight, bias)
    assert out.shape == (N, Cout, H, W)
    # bf16 MXU operands vs f32 reference -> ~1e-3 abs error; 5e-2 leaves margin.
    assert jnp.allclose(out, ref, atol=5e-2, rtol=5e-2)
    print("KERNEL_OK")
</pallas_src>

<mosaic_0001>
module attributes {stable_mosaic.version = 11 : i64} {
  func.func @conv3_silu_kernel(%arg0: i32, %arg1: memref<1x16x192xf32, #tpu.memory_space<vmem>>, %arg2: memref<192x128xbf16, #tpu.memory_space<vmem>>, %arg3: memref<1x128xf32, #tpu.memory_space<vmem>>, %arg4: memref<1x16x128xf32, #tpu.memory_space<vmem>>) attributes {dimension_semantics = [#tpu.dimension_semantics<parallel>], iteration_bounds = array<i64: 2>, scalar_prefetch = 0 : i64, scratch_operands = 0 : i64, tpu.core_type = #tpu.core_type<tc>, window_params = [{transform_indices = @transform_0, window_bounds = array<i64: 1, 16, 192>}, {pipeline_mode = #tpu.pipeline_mode<synchronous>, transform_indices = @transform_1, window_bounds = array<i64: 192, 128>}, {pipeline_mode = #tpu.pipeline_mode<synchronous>, transform_indices = @transform_2, window_bounds = array<i64: 1, 128>}, {transform_indices = @transform_3, window_bounds = array<i64: 1, 16, 128>}]} {
    %c0 = arith.constant 0 : index
    %c0_0 = arith.constant 0 : index
    %c0_1 = arith.constant 0 : index
    %0 = vector.load %arg1[%c0, %c0_0, %c0_1] : memref<1x16x192xf32, #tpu.memory_space<vmem>>, vector<1x16x192xf32>
    %1 = vector.shape_cast %0 : vector<1x16x192xf32> to vector<16x192xf32>
    %2 = arith.truncf %1 : vector<16x192xf32> to vector<16x192xbf16>
    %c0_2 = arith.constant 0 : index
    %c0_3 = arith.constant 0 : index
    %3 = vector.load %arg2[%c0_2, %c0_3] : memref<192x128xbf16, #tpu.memory_space<vmem>>, vector<192x128xbf16>
    %cst = arith.constant dense<0.000000e+00> : vector<16x128xf32>
    %4 = tpu.matmul %2, %3, %cst {dimension_numbers = #tpu.dot_dimension_numbers<[1], [0], [0], [1], [0, 0, 1, 1], [], []>} : vector<16x192xbf16>, vector<192x128xbf16>, vector<16x128xf32> -> vector<16x128xf32>
    %c0_4 = arith.constant 0 : index
    %c0_5 = arith.constant 0 : index
    %5 = vector.load %arg3[%c0_4, %c0_5] : memref<1x128xf32, #tpu.memory_space<vmem>>, vector<1x128xf32>
    %6 = vector.broadcast %5 : vector<1x128xf32> to vector<16x128xf32>
    %7 = arith.addf %4, %6 : vector<16x128xf32>
    %8 = arith.negf %7 : vector<16x128xf32>
    %9 = math.exp %8 : vector<16x128xf32>
    %cst_6 = arith.constant 1.000000e+00 : f32
    %10 = vector.broadcast %cst_6 : f32 to vector<16x128xf32>
    %11 = arith.addf %10, %9 : vector<16x128xf32>
    %12 = arith.divf %10, %11 : vector<16x128xf32>
    %13 = arith.mulf %7, %12 : vector<16x128xf32>
    %c0_7 = arith.constant 0 : index
    %c0_8 = arith.constant 0 : index
    %c0_9 = arith.constant 0 : index
    %14 = vector.load %arg4[%c0_7, %c0_8, %c0_9] : memref<1x16x128xf32, #tpu.memory_space<vmem>>, vector<1x16x128xf32>
    %15 = vector.shape_cast %14 : vector<1x16x128xf32> to vector<16x128xf32>
    %16 = vector.shape_cast %13 : vector<16x128xf32> to vector<1x16x128xf32>
    tpu.vector_store %arg4[%c0_7, %c0_8, %c0_9], %16 {strides = array<i32>} : memref<1x16x128xf32, #tpu.memory_space<vmem>>, vector<1x16x128xf32>,
    return
  }
  func.func @transform_0(%arg0: i32) -> (i32, i32, i32) {
    %c0_i32 = arith.constant 0 : i32
    %c0_i32_0 = arith.constant 0 : i32
    %c0_i32_1 = arith.constant 0 : i32
    return %arg0, %c0_i32, %c0_i32_0 : i32, i32, i32
  }
  func.func @transform_1(%arg0: i32) -> (i32, i32) {
    %c0_i32 = arith.constant 0 : i32
    %c0_i32_0 = arith.constant 0 : i32
    %c0_i32_1 = arith.constant 0 : i32
    return %c0_i32, %c0_i32_0 : i32, i32
  }
  func.func @transform_2(%arg0: i32) -> (i32, i32) {
    %c0_i32 = arith.constant 0 : i32
    %c0_i32_0 = arith.constant 0 : i32
    %c0_i32_1 = arith.constant 0 : i32
    return %c0_i32, %c0_i32_0 : i32, i32
  }
  func.func @transform_3(%arg0: i32) -> (i32, i32, i32) {
    %c0_i32 = arith.constant 0 : i32
    %c0_i32_0 = arith.constant 0 : i32
    %c0_i32_1 = arith.constant 0 : i32
    return %arg0, %c0_i32, %c0_i32_0 : i32, i32, i32
  }
}

</mosaic_0001>

<bundles_post_ra>
// kernel: conv3block_forward.1
= control target key start
LH: loop header
LB: loop body
LE: loop exit
PB: predicated region body
PF: predicated region fallthrough
CT: control target
= control target key end

     0   :  { %s484_s12 = smov 0   ;;  %s550_s0 = inlined_call_operand.vmem [shape: f32[2,16,192], index: 0, kind: input, shape index: {}]   ;;  %s551_s1 = inlined_call_operand.vmem [shape: bf16[192,128], index: 1, kind: input, shape index: {}]   ;;  %s552_s2 = inlined_call_operand.vmem [shape: f32[1,128], index: 2, kind: input, shape index: {}]   ;;  %s553_s3 = inlined_call_operand.vmem [shape: f32[2,16,128], index: 3, kind: output, shape index: {}]  }
   0x1 LB: > { %s397_s13 = sadd.s32 4294967295, %s461_s12   ;;  %p401_p0 = scmp.ge.s32.totalorder %s461_s12, 1  ;;  %s461_s12 = sphi %s484_s12, %s13_s12  }
   0x2   : > { %p137_p1 = scmp.lt.s32.totalorder %s461_s12, 3 }
   0x4   : > { %p138_p2 = pnand %p401_p0, %p137_p1 }
   0x5   : > { %v435_v0 = vld [vmem:[%s551_s1] sm:$0xff] (!%p138_p2)   ;;  %v463_v1 = vmov (!%p138_p2), 0   ;;  %p161_p3 = scmp.lt.s32.totalorder (!%p138_p2), %s397_s13, 1  ;;  %v436_v2 = vld [vmem:[%s551_s1 + $0x8] sm:$0xff] (!%p138_p2)   ;;  %v437_v3 = vld [vmem:[%s551_s1 + $0x10] sm:$0xff] (!%p138_p2)   ;;  %vm281_vm0 = vcmask (!%p138_p2), 523264  }
   0x6   : > { %141 = sbr.rel (%p138_p2) target bundleno = 299 (0x12b), region = 32  ;;  %285 = vmatprep.subr.bf16.mxu0 (!%p138_p2), %v463_v1  ;;  %v438_v4 = vld [vmem:[%s551_s1 + $0x18] sm:$0xff] (!%p138_p2)   ;;  %v439_v8 = vld [vmem:[%s551_s1 + $0x20] sm:$0xff] (!%p138_p2)   ;;  %v440_v9 = vld [vmem:[%s551_s1 + $0x28] sm:$0xff] (!%p138_p2)  }
   0x7   : > { %286 = vmatpush1.bf16.msra.mxu0 (!%p138_p2), %v435_v0  ;;  %v441_v10 = vld [vmem:[%s551_s1 + $0x30] sm:$0xff] (!%p138_p2)   ;;  %v442_v11 = vld [vmem:[%s551_s1 + $0x38] sm:$0xff] (!%p138_p2)   ;;  %v443_v12 = vld [vmem:[%s551_s1 + $0x40] sm:$0xff] (!%p138_p2)  }
   0x8   : > { %287 = vmatprep.subr.bf16.mxu0 (!%p138_p2), %v463_v1  ;;  %v444_v13 = vld [vmem:[%s551_s1 + $0x48] sm:$0xff] (!%p138_p2)   ;;  %v445_v14 = vld [vmem:[%s551_s1 + $0x50] sm:$0xff] (!%p138_p2)   ;;  %v446_v15 = vld [vmem:[%s551_s1 + $0x58] sm:$0xff] (!%p138_p2)  }
   0x9   : > { %v406_v19 = vld [vmem:[%s552_s2] ss:$0 sm:$0xff] (!%p138_p2) }
   0xb   : > { %288 = vmatpush1.bf16.msra.mxu0 (!%p138_p2), %v436_v2 }
   0xc   : > { %289 = vmatprep.subr.bf16.mxu0 (!%p138_p2), %v463_v1 }
   0xd   : > { %s555_s13 = smov (!%p161_p3, %s397_s13), 1 }
   0xe   : > { %s424_s20 = sshll.u32 %s555_s13, 5  ;;  %s425_s19 = sshll.u32 %s555_s13, 4 }
   0xf   : > { %s507_s23 = scalar_lea.vmem %s550_s0, %s424_s20  ;;  %290 = vmatpush1.bf16.msra.mxu0 %v437_v3  ;;  %s170_s22 = scalar_lea.vmem %s553_s3, %s425_s19 }
  0x10   : > { %291 = vmatprep.subr.bf16.mxu0 %v463_v1  ;;  %v173_v5 = vld [vmem:[%s507_s23 + $0x8] sm:$0xff]  ;;  %v175_v6 = vld [vmem:[%s507_s23 + $0x18] sm:$0xff]  ;;  %v172_v16 = vld [vmem:[%s507_s23] sm:$0xff] }
  0x11   : > { %v177_v7 = vpack.c.bf16 %v175_v6, %v173_v5  ;;  %v174_v17 = vld [vmem:[%s507_s23 + $0x10] sm:$0xff] }
  0x12   : > { %v176_v18 = vpack.c.bf16 %v174_v17, %v172_v16 }
  0x13   : > { %292 = vmatpush1.bf16.msra.mxu0 %v438_v4  ;;  %419 = vmatprep.mubr.msk.bf16.mxu0 %vm281_vm0, %v177_v7 }
  0x14   : > { %293 = vmatprep.subr.bf16.mxu0 %v463_v1 }
  0x17   : > { %294 = vmatpush1.bf16.msra.mxu0 %v439_v8 }
  0x18   : > { %295 = vmatprep.subr.bf16.mxu0 %v463_v1 }
  0x1b   : > { %296 = vmatpush1.bf16.msra.mxu0 %v440_v9 }
  0x1c   : > { %297 = vmatprep.subr.bf16.mxu0 %v463_v1 }
  0x1f   : > { %298 = vmatpush1.bf16.msra.mxu0 %v441_v10 }
  0x20   : > { %299 = vmatprep.subr.bf16.mxu0 %v463_v1 }
  0x23   : > { %300 = vmatpush1.bf16.msra.mxu0 %v442_v11 }
  0x24   : > { %301 = vmatprep.subr.bf16.mxu0 %v463_v1 }
  0x27   : > { %302 = vmatpush1.bf16.msra.mxu0 %v443_v12 }
  0x28   : > { %303 = vmatprep.subr.bf16.mxu0 %v463_v1 }
  0x2b   : > { %304 = vmatpush1.bf16.msra.mxu0 %v444_v13 }
  0x2c   : > { %305 = vmatprep.subr.bf16.mxu0 %v463_v1 }
  0x2f   : > { %306 = vmatpush1.bf16.msra.mxu0 %v445_v14 }
  0x30   : > { %307 = vmatprep.subr.bf16.mxu0 %v463_v1 }
  0x33   : > { %308 = vmatpush1.bf16.msra.mxu0 %v446_v15 }
  0x36   : > { %318 = vmatmul.mubr.bf16.vlgmr.msra.gmra.mrb[0].mxu0 %v176_v18 }
 0x109   : > { %v319_v20 = vpop.f32.mrb[0].mxu0 }
 0x10a   : > { %v320_v21 = vadd.f32 %v406_v19, %v319_v20  ;;  %v321_v22 = vpop.f32.mrb[1].mxu0 }
 0x10b   : > { %v322_v23 = vpop.f32.mrb[2].mxu0 }
 0x10c   : > { %v420_v24 = vmul.f32 -1.442695, %v320_v21  ;;  %v323_v25 = vadd.f32 %v406_v19, %v322_v23  ;;  %v324_v26 = vpop.f32.mrb[3].mxu0 }
 0x10e   : > { %447 = vpow2.f32 %v420_v24  ;;  %v421_v27 = vmul.f32 -1.442695, %v323_v25 }
 0x110   : > { %449 = vpow2.f32 %v421_v27 }
 0x118   : > { %v448_v28 = vpop.eup %447 }
 0x119   : > { %v332_v29 = vadd.f32 1.0, %v448_v28 }
 0x11a   : > { %v450_v30 = vpop.eup %449 }
 0x11b   : > { %451 = vrcp.f32 %v332_v29  ;;  %v333_v31 = vadd.f32 1.0, %v450_v30 }
 0x11d   : > { %453 = vrcp.f32 %v333_v31 }
 0x125   : > { %v452_v32 = vpop.eup %451 }
 0x126   : > { %v338_v33 = vmul.f32 %v452_v32, %v320_v21 }
 0x127   : > { %v454_v34 = vpop.eup %453 }
 0x128   : > { %340 = vst [vmem:[%s170_s22] sm:$0xff] %v338_v33  ;;  %v339_v35 = vmul.f32 %v454_v34, %v323_v25 }
 0x12a   : > { %341 = vst [vmem:[%s170_s22 + $0x8] sm:$0xff] %v339_v35 }
 0x12b PF: > { %s13_s12 = sadd.s32 1, %s461_s12  }
 0x12c   : > { %p10_p4 = scmp.ge.s32.totalorder %s13_s12, 4  }
 0x12e   :  { %12 = sbr.rel (!%p10_p4) target bundleno = 1 (0x1), region = 62 }

</bundles_post_ra>
